<compile_context>
chip_gen: v7x
topology: tpu7x:2x2x1
jax: 0.10.0
libtpu: 0.0.40
codegen_flags: <defaults>
</compile_context>

<pallas_src>
import numpy as np
import jax
import jax.numpy as jnp
from jax.experimental import pallas as pl
from jax.experimental.pallas import tpu as pltpu  # noqa: F401  (imported per spec; no TPU-specific params needed)

# ----------------------------- hyper-parameters (small) -----------------------------
STATE_DIM = 4
ACTION_DIM = 2
HORIZON = 5
IMAGE_SIZE = (16, 16)
ENV_DIM = 8
HIDDEN_DIM = 32
FLOW_LENGTH = 2                                   # -> 3 MAF layers, 2 ActNorm, 2 Permutation
FLOW_DIM = STATE_DIM * HORIZON                    # 20
CONTEXT_DIM = STATE_DIM + ACTION_DIM * HORIZON + ENV_DIM + 1   # 23
L_SA = STATE_DIM + ACTION_DIM * HORIZON           # 14  ([start | action] context rows)
N_FEAT = (IMAGE_SIZE[0] // 2) * (IMAGE_SIZE[1] // 2) * 4       # 256 conv features
N_MLP = FLOW_LENGTH + 2                           # 4 MLPs: prior + 3 MAF layers
OUT_LANES = 128

# ----- input slab lane layout: [img | start | act | eps] -----
C_IMG = 0
C_START = N_FEAT                                  # 256
C_ACT = N_FEAT + STATE_DIM                        # 260
C_EPS = N_FEAT + L_SA                             # 270
IN_LANES = N_FEAT + L_SA + FLOW_DIM               # 290

# ----- packed (N_WROWS, 128) f32 weight-slab row layout (every block 8-row aligned) -----
R_WCSA = 0                                        # (14, 128)  [start|act] -> 4x32 context hidden
R_WCF = 16                                        # (256,128)  conv feat   -> 4x32 context hidden (FC folded)
R_B1 = 272                                        # (1, 128)   fused context bias (FC bias + norm folds)
R_CB = 280                                        # (2, 128)   conv bias, split into two 128-lane halves
R_W1X = 288                                       # (20, 96)   3 MAF x-weights, 32 lanes each
R_W2 = 312                                        # (128, 40)  4 fused (mu|log_sigma) heads, 32 rows each
R_B2 = R_W2 + N_MLP * HIDDEN_DIM                  # 440: (4, 40) head biases
R_PS = 448                                        # (4, 20)    start broadcast (cumsum + de-norm folded)
R_PX = 456                                        # (20, 20)   cumsum o final-permutation o flow_std
R_PB = 480                                        # (1, 20)    flow_mean + norm folds
N_WROWS = 488


# ----------------------------------- fused kernel ----------------------------------
def _fused_forward_kernel(inp_ref, enc_ref, w_ref, out_ref):
    f32 = jnp.float32

    def dot(a, b):
        return jnp.dot(a, b, preferred_element_type=f32)

    inp = inp_ref[...]                                                  # (Bp, 290) f32

    # ---- encoder: 3x3 stride-2 conv folded to one (256,256) bf16 matmul, bias, ReLU ----
    cb = jnp.concatenate([w_ref[R_CB:R_CB + 1, :], w_ref[R_CB + 1:R_CB + 2, :]], axis=-1)  # (1, 256)
    feat = jnp.maximum(
        dot(inp[:, C_IMG:C_IMG + N_FEAT].astype(jnp.bfloat16), enc_ref[...]) + cb, 0.0)    # (Bp, 256)

    # ---- fused context pre-activations for all 4 MLPs (prior + 3 MAF): one (Bp,128) slab ----
    # (post-conv FC is folded into the feat rows; state/action normalization folded into the sa rows)
    ctx = (dot(inp[:, C_START:C_START + L_SA], w_ref[R_WCSA:R_WCSA + L_SA, :])
           + dot(feat, w_ref[R_WCF:R_WCF + N_FEAT, :])
           + w_ref[R_B1:R_B1 + 1, :])                                   # (Bp, 128)

    def head(l, h):
        # fused (mu | log_sigma) head: one matmul, static lane split
        o = (dot(h, w_ref[R_W2 + HIDDEN_DIM * l:R_W2 + HIDDEN_DIM * (l + 1), 0:2 * FLOW_DIM])
             + w_ref[R_B2 + l:R_B2 + l + 1, 0:2 * FLOW_DIM])            # (Bp, 40)
        return o[:, 0:FLOW_DIM], o[:, FLOW_DIM:2 * FLOW_DIM]

    # ---- conditional prior: z = mu + sigma * eps, Gaussian log-prob ----
    eps = inp[:, C_EPS:C_EPS + FLOW_DIM]                                # (Bp, 20)
    h0 = jnp.maximum(ctx[:, 0:HIDDEN_DIM], 0.0)
    mu0, ls0 = head(0, h0)
    z = mu0 + jnp.exp(ls0) * eps
    logp = jnp.sum(-0.5 * eps * eps - ls0 - 0.5 * jnp.log(2.0 * jnp.pi),
                   axis=-1, keepdims=True)                              # (Bp, 1)

    # ---- MAF stack, z -> x (Permutation / ActNorm folded into the weights at init) ----
    x = z
    for l in range(1, N_MLP):
        w1x = w_ref[R_W1X:R_W1X + FLOW_DIM, HIDDEN_DIM * (l - 1):HIDDEN_DIM * l]   # (20, 32)
        h = jnp.maximum(dot(x, w1x) + ctx[:, HIDDEN_DIM * l:HIDDEN_DIM * (l + 1)], 0.0)
        mu, ls = head(l, h)
        x = x * jnp.exp(ls) + mu
        logp = logp - jnp.sum(ls, axis=-1, keepdims=True)

    # ---- relative-displacement cumsum + flow de-normalization (folded into PS / PX / PB) ----
    traj = (dot(inp[:, C_START:C_START + STATE_DIM], w_ref[R_PS:R_PS + STATE_DIM, 0:FLOW_DIM])
            + dot(x, w_ref[R_PX:R_PX + FLOW_DIM, 0:FLOW_DIM])
            + w_ref[R_PB:R_PB + 1, 0:FLOW_DIM])                         # (Bp, 20)

    # ---- lane-dense output: lanes [0:20] = traj, lane 20 = logp (remaining lanes unused) ----
    out_ref[:, 0:FLOW_DIM] = traj
    out_ref[:, FLOW_DIM:FLOW_DIM + 1] = logp


# --------------------------------- parameter setup ------------------------------------
def init_params(key):
    ks = jax.random.split(key, 16)

    def w(k, shape, scale=0.05):
        return np.asarray(jax.random.normal(k, shape, jnp.float32)) * np.float32(scale)

    H, S, A, E, D, HID = HORIZON, STATE_DIM, ACTION_DIM, ENV_DIM, FLOW_DIM, HIDDEN_DIM

    # registered buffers (defaults: zero mean / unit std) — folded into weights below
    state_mean = np.zeros(S, np.float32); state_std = np.ones(S, np.float32)
    action_mean = np.zeros(A, np.float32); action_std = np.ones(A, np.float32)
    image_mean = np.float32(0.0); image_std = np.float32(1.0)
    flow_mean = np.zeros(S, np.float32); flow_std = np.ones(S, np.float32)

    # ---------- encoder: 3x3 stride-2 conv (1->4 ch, pad=1) folded to a dense matmul + FC ----------
    # TODO(synk): exact Encoder(image_size, env_dim) architecture is not in the reference source.
    conv_w = w(ks[0], (9, 4))
    conv_b = np.zeros(4, np.float32)
    HO, WO = IMAGE_SIZE[0] // 2, IMAGE_SIZE[1] // 2
    CW = np.zeros((IMAGE_SIZE[0] * IMAGE_SIZE[1], HO * WO * 4), np.float32)
    for ho in range(HO):
        for wo in range(WO):
            o = (ho * WO + wo) * 4
            for dy in range(3):
                for dx in range(3):
                    iy, ix = 2 * ho + dy - 1, 2 * wo + dx - 1          # PyTorch-style symmetric pad=1
                    if 0 <= iy < IMAGE_SIZE[0] and 0 <= ix < IMAGE_SIZE[1]:
                        CW[iy * IMAGE_SIZE[1] + ix, o:o + 4] += conv_w[dy * 3 + dx, :]
    CB = np.tile(conv_b, HO * WO)                                       # (256,)
    FCW = w(ks[1], (HO * WO * 4, E))
    FCB = np.zeros(E, np.float32)

    # fold (image - mean)/std into the conv matmul / bias
    CW_f = CW / image_std
    CB_f = CB - (image_mean / image_std) * CW.sum(axis=0)

    # ---------- MADE degrees / masks ----------
    var_deg = np.repeat(np.arange(H, dtype=np.float32), S) + 1.0
    hid_deg = (np.arange(HID) % H).astype(np.float32)
    out_deg = np.tile(var_deg, 2)

    def context_order(fwd):
        a = np.repeat(np.arange(H, dtype=np.float32), A)
        if not fwd:
            a = a[::-1].copy()
        return np.concatenate([np.zeros(S, np.float32), a,
                               np.zeros(E, np.float32), np.zeros(1, np.float32)])

    def made_masks(in_deg):
        m1 = (hid_deg[None, :] >= in_deg[:, None]).astype(np.float32)
        m2 = (out_deg[None, :] > hid_deg[:, None]).astype(np.float32)
        return m1, m2

    # ---------- conditional prior (MLP index 0) ----------
    # TODO(synk): flows.ConditionalPrior internals not provided; MADE-masked conditional Gaussian used.
    m1, m2 = made_masks(context_order(True))
    pw1 = w(ks[2], (CONTEXT_DIM, HID)) * m1
    pw2 = w(ks[3], (HID, 2 * D)) * m2
    mlps = [dict(w1c=pw1, b1=np.zeros(HID, np.float32),
                 w2mu=pw2[:, :D].copy(), w2ls=pw2[:, D:].copy(),
                 b2mu=np.zeros(D, np.float32), b2ls=np.zeros(D, np.float32))]
    W1X_list = []

    # ---------- autoregressive flow: [MAF, ActNorm, Permutation] * FLOW_LENGTH + MAF ----------
    # TODO(synk): flows.MaskedAutoRegressiveLayer internals not in the reference source; a MADE-masked
    #             single-pass affine autoregressive layer (IAF parametrization in z->x direction) is used.
    R = np.arange(D)[::-1]
    perm = np.arange(D)                      # virtual variable = physical[perm]
    kidx, fwd = 4, True
    for li in range(FLOW_LENGTH + 1):
        in_deg = np.concatenate([var_deg, context_order(fwd)])
        m1, m2 = made_masks(in_deg)
        w1 = w(ks[kidx], (D + CONTEXT_DIM, HID)) * m1
        w2 = w(ks[kidx + 1], (HID, 2 * D)) * m2
        kidx += 2

        inv = np.argsort(perm)
        w1x = w1[:D, :][inv, :].copy()               # fold accumulated permutation into input rows
        w2mu = w2[:, :D][:, inv].copy()              # ... and into (mu, log_s) output channels
        w2ls = w2[:, D:][:, inv].copy()
        b2mu = np.zeros(D, np.float32)
        b2ls = np.zeros(D, np.float32)
        if li < FLOW_LENGTH:
            # TODO(synk): ActNorm data-dependent init (initialized=False) replaced by identity params.
            an_logs = np.zeros(D, np.float32)[inv]
            an_bias = np.zeros(D, np.float32)[inv]
            scale = np.exp(an_logs)
            w2mu = w2mu * scale[None, :]             # fold ActNorm into the MAF affine
            b2mu = b2mu * scale + an_bias
            b2ls = b2ls + an_logs                    # ldj contribution folded into log_s
            perm = perm[R]                           # Permutation(reversed(arange)) -> compile-time shuffle

        W1X_list.append(w1x)
        mlps.append(dict(w1c=w1[D:, :].copy(), b1=np.zeros(HID, np.float32),
                         w2mu=w2mu, w2ls=w2ls, b2mu=b2mu, b2ls=b2ls))
        fwd = not fwd

    # ---------- fused context weights (all 4 MLPs side-by-side in lanes; FC + norm folds) ----------
    sa_std = np.concatenate([state_std, np.tile(action_std, H)])        # (14,)
    sa_mean = np.concatenate([state_mean, np.tile(action_mean, H)])     # (14,)

    WC_SA = np.zeros((L_SA, HID * N_MLP), np.float32)
    WC_F = np.zeros((N_FEAT, HID * N_MLP), np.float32)
    B1_ALL = np.zeros((HID * N_MLP,), np.float32)
    for l, m in enumerate(mlps):
        w1c = m['w1c']                               # (23, 32)
        w_sa = w1c[:L_SA, :]
        w_env = w1c[L_SA:L_SA + E, :]
        # noise-magnitude context row (w1c[-1]) is always 0 in the sampling direction -> dropped.
        cols = slice(HID * l, HID * (l + 1))
        WC_SA[:, cols] = w_sa / sa_std[:, None]
        WC_F[:, cols] = FCW @ w_env
        B1_ALL[cols] = m['b1'] + FCB @ w_env - (sa_mean / sa_std) @ w_sa

    W1X_ALL = np.concatenate(W1X_list, axis=1)                                        # (20, 96)
    W2_ALL = np.concatenate([np.concatenate([m['w2mu'], m['w2ls']], axis=1)
                             for m in mlps], axis=0)                                  # (128, 40)
    B2_ALL = np.stack([np.concatenate([m['b2mu'], m['b2ls']]) for m in mlps], axis=0)  # (4, 40)

    # ---------- relative-displacement cumsum + de-normalization, folded to matmuls ----------
    fs20 = np.tile(flow_std, H)
    fm20 = np.tile(flow_mean, H)
    T = np.tile(np.eye(S, dtype=np.float32), (1, H))                                   # start broadcast
    C = np.kron(np.triu(np.ones((H, H), np.float32)), np.eye(S, dtype=np.float32))     # cumsum over horizon
    inv_final = np.argsort(perm)
    PS = T * fs20[None, :]                           # acts on normalized start
    PX = C[inv_final, :] * fs20[None, :]             # (20, 20)
    PS_f = PS / state_std[:, None]                   # fold (start - mean)/std
    PB_f = fm20 - (state_mean / state_std) @ PS      # (20,)

    # ---------- pack everything except the conv weight into one (488, 128) f32 slab ----------
    wslab = np.zeros((N_WROWS, 128), np.float32)
    wslab[R_WCSA:R_WCSA + L_SA, :] = WC_SA
    wslab[R_WCF:R_WCF + N_FEAT, :] = WC_F
    wslab[R_B1, :] = B1_ALL
    wslab[R_CB, :] = CB_f[:128]
    wslab[R_CB + 1, :] = CB_f[128:]
    wslab[R_W1X:R_W1X + FLOW_DIM, 0:HID * (N_MLP - 1)] = W1X_ALL
    wslab[R_W2:R_W2 + N_MLP * HID, 0:2 * D] = W2_ALL
    wslab[R_B2:R_B2 + N_MLP, 0:2 * D] = B2_ALL
    wslab[R_PS:R_PS + S, 0:D] = PS_f
    wslab[R_PX:R_PX + D, 0:D] = PX
    wslab[R_PB, 0:D] = PB_f

    return {'enc': jnp.asarray(CW_f, jnp.bfloat16),       # the only non-trivial weight, bf16 halves DMA
            'wslab': jnp.asarray(wslab, jnp.float32)}


# ----------------------------------- model forward ------------------------------------
def forward(params, start_state, action, image, eps):
    """ImageFlowModel.forward with reverse=False, reconstruct=False (single fused Pallas call)."""
    B = start_state.shape[0]
    img = image.reshape(image.shape[0], IMAGE_SIZE[0] * IMAGE_SIZE[1]).astype(jnp.float32)
    n_rep = B // image.shape[0]
    if n_rep > 1:                                   # env-code row-repeat (done on the tiny image instead)
        img = jnp.repeat(img, n_rep, axis=0)
    act_flat = action.reshape(B, HORIZON * ACTION_DIM).astype(jnp.float32)

    b_pad = ((B + 7) // 8) * 8                      # full sublane tiles inside the kernel
    # one lane-dense input slab: [img | start | act | eps]; (x-mean)/std folds live in the weights
    slab = jnp.concatenate([img, start_state.astype(jnp.float32), act_flat,
                            eps.astype(jnp.float32)], axis=-1)
    slab = jnp.pad(slab, ((0, b_pad - B), (0, 0)))

    out = pl.pallas_call(                            # no grid: single invocation, no pipeline machinery
        _fused_forward_kernel,
        out_shape=jax.ShapeDtypeStruct((b_pad, OUT_LANES), jnp.float32),
    )(slab, params['enc'], params['wslab'])

    traj = out[:B, :FLOW_DIM].reshape(B, HORIZON, STATE_DIM)
    logp = out[:B, FLOW_DIM]
    return {'traj': traj, 'logp': logp, 'image_reconstruct': None, 'contact_logit': None}


# --------------------------------------- main ------------------------------------------
if __name__ == "__main__":
    key = jax.random.PRNGKey(0)
    kp, kst, ka, ki, ke = jax.random.split(key, 5)
    params = init_params(kp)

    B = 2
    start_state = jax.random.normal(kst, (B, STATE_DIM), jnp.float32)
    action = jax.random.normal(ka, (B, HORIZON, ACTION_DIM), jnp.float32)
    image = jax.random.normal(ki, (B, 1, IMAGE_SIZE[0], IMAGE_SIZE[1]), jnp.float32)
    eps = jax.random.normal(ke, (B, FLOW_DIM), jnp.float32)   # prior sampling noise (deterministic)

    fwd = jax.jit(lambda s, a, img, e: forward(params, s, a, img, e))
    out = fwd(start_state, action, image, eps)
    jax.block_until_ready((out['traj'], out['logp']))

    assert out['traj'].shape == (B, HORIZON, STATE_DIM)
    assert out['logp'].shape == (B,)
    assert bool(jnp.all(jnp.isfinite(out['traj']))) and bool(jnp.all(jnp.isfinite(out['logp'])))
    print("KERNEL_OK")
</pallas_src>

<mosaic_0001>
module attributes {stable_mosaic.version = 11 : i64} {
  func.func @_fused_forward_kernel(%arg0: memref<8x290xf32, #tpu.memory_space<vmem>>, %arg1: memref<256x256xbf16, #tpu.memory_space<vmem>>, %arg2: memref<488x128xf32, #tpu.memory_space<vmem>>, %arg3: memref<8x128xf32, #tpu.memory_space<vmem>>) attributes {dimension_semantics = [], scalar_prefetch = 0 : i64, scratch_operands = 0 : i64, tpu.core_type = #tpu.core_type<tc>} {
    %c0 = arith.constant 0 : index
    %c0_0 = arith.constant 0 : index
    %0 = vector.load %arg0[%c0, %c0_0] : memref<8x290xf32, #tpu.memory_space<vmem>>, vector<8x290xf32>
    %c280 = arith.constant 280 : index
    %c0_1 = arith.constant 0 : index
    %1 = vector.load %arg2[%c280, %c0_1] : memref<488x128xf32, #tpu.memory_space<vmem>>, vector<1x128xf32>
    %c281 = arith.constant 281 : index
    %c0_2 = arith.constant 0 : index
    %2 = vector.load %arg2[%c281, %c0_2] : memref<488x128xf32, #tpu.memory_space<vmem>>, vector<1x128xf32>
    %3 = tpu.concatenate %1, %2 in 1 : vector<1x128xf32>, vector<1x128xf32> -> vector<1x256xf32>
    %4 = vector.extract_strided_slice %0 {offsets = [0, 0], sizes = [8, 256], strides = [1, 1]} : vector<8x290xf32> to vector<8x256xf32>
    %5 = arith.truncf %4 : vector<8x256xf32> to vector<8x256xbf16>
    %c0_3 = arith.constant 0 : index
    %c0_4 = arith.constant 0 : index
    %6 = vector.load %arg1[%c0_3, %c0_4] : memref<256x256xbf16, #tpu.memory_space<vmem>>, vector<256x256xbf16>
    %cst = arith.constant dense<0.000000e+00> : vector<8x256xf32>
    %7 = tpu.matmul %5, %6, %cst {dimension_numbers = #tpu.dot_dimension_numbers<[1], [0], [0], [1], [0, 0, 1, 1], [], []>} : vector<8x256xbf16>, vector<256x256xbf16>, vector<8x256xf32> -> vector<8x256xf32>
    %8 = vector.broadcast %3 : vector<1x256xf32> to vector<8x256xf32>
    %9 = arith.addf %7, %8 : vector<8x256xf32>
    %cst_5 = arith.constant 0.000000e+00 : f32
    %10 = vector.broadcast %cst_5 : f32 to vector<8x256xf32>
    %11 = arith.maximumf %9, %10 : vector<8x256xf32>
    %12 = vector.extract_strided_slice %0 {offsets = [0, 256], sizes = [8, 14], strides = [1, 1]} : vector<8x290xf32> to vector<8x14xf32>
    %c0_6 = arith.constant 0 : index
    %c0_7 = arith.constant 0 : index
    %13 = vector.load %arg2[%c0_6, %c0_7] : memref<488x128xf32, #tpu.memory_space<vmem>>, vector<14x128xf32>
    %cst_8 = arith.constant dense<0.000000e+00> : vector<8x128xf32>
    %14 = tpu.matmul %12, %13, %cst_8 {dimension_numbers = #tpu.dot_dimension_numbers<[1], [0], [0], [1], [0, 0, 1, 1], [], []>} : vector<8x14xf32>, vector<14x128xf32>, vector<8x128xf32> -> vector<8x128xf32>
    %c16 = arith.constant 16 : index
    %c0_9 = arith.constant 0 : index
    %15 = vector.load %arg2[%c16, %c0_9] : memref<488x128xf32, #tpu.memory_space<vmem>>, vector<256x128xf32>
    %cst_10 = arith.constant dense<0.000000e+00> : vector<8x128xf32>
    %16 = tpu.matmul %11, %15, %cst_10 {dimension_numbers = #tpu.dot_dimension_numbers<[1], [0], [0], [1], [0, 0, 1, 1], [], []>} : vector<8x256xf32>, vector<256x128xf32>, vector<8x128xf32> -> vector<8x128xf32>
    %17 = arith.addf %14, %16 : vector<8x128xf32>
    %c272 = arith.constant 272 : index
    %c0_11 = arith.constant 0 : index
    %18 = vector.load %arg2[%c272, %c0_11] : memref<488x128xf32, #tpu.memory_space<vmem>>, vector<1x128xf32>
    %19 = vector.broadcast %18 : vector<1x128xf32> to vector<8x128xf32>
    %20 = arith.addf %17, %19 : vector<8x128xf32>
    %21 = vector.extract_strided_slice %0 {offsets = [0, 270], sizes = [8, 20], strides = [1, 1]} : vector<8x290xf32> to vector<8x20xf32>
    %22 = vector.extract_strided_slice %20 {offsets = [0, 0], sizes = [8, 32], strides = [1, 1]} : vector<8x128xf32> to vector<8x32xf32>
    %cst_12 = arith.constant 0.000000e+00 : f32
    %23 = vector.broadcast %cst_12 : f32 to vector<8x32xf32>
    %24 = arith.maximumf %22, %23 : vector<8x32xf32>
    %c312 = arith.constant 312 : index
    %c0_13 = arith.constant 0 : index
    %25 = vector.load %arg2[%c312, %c0_13] : memref<488x128xf32, #tpu.memory_space<vmem>>, vector<32x40xf32>
    %cst_14 = arith.constant dense<0.000000e+00> : vector<8x40xf32>
    %26 = tpu.matmul %24, %25, %cst_14 {dimension_numbers = #tpu.dot_dimension_numbers<[1], [0], [0], [1], [0, 0, 1, 1], [], []>} : vector<8x32xf32>, vector<32x40xf32>, vector<8x40xf32> -> vector<8x40xf32>
    %c440 = arith.constant 440 : index
    %c0_15 = arith.constant 0 : index
    %27 = vector.load %arg2[%c440, %c0_15] : memref<488x128xf32, #tpu.memory_space<vmem>>, vector<1x40xf32>
    %28 = vector.broadcast %27 : vector<1x40xf32> to vector<8x40xf32>
    %29 = arith.addf %26, %28 : vector<8x40xf32>
    %30 = vector.extract_strided_slice %29 {offsets = [0, 0], sizes = [8, 20], strides = [1, 1]} : vector<8x40xf32> to vector<8x20xf32>
    %31 = vector.extract_strided_slice %29 {offsets = [0, 20], sizes = [8, 20], strides = [1, 1]} : vector<8x40xf32> to vector<8x20xf32>
    %32 = math.exp %31 : vector<8x20xf32>
    %33 = arith.mulf %32, %21 : vector<8x20xf32>
    %34 = arith.addf %30, %33 : vector<8x20xf32>
    %cst_16 = arith.constant -5.000000e-01 : f32
    %35 = vector.broadcast %cst_16 : f32 to vector<8x20xf32>
    %36 = arith.mulf %35, %21 : vector<8x20xf32>
    %37 = arith.mulf %36, %21 : vector<8x20xf32>
    %38 = arith.subf %37, %31 : vector<8x20xf32>
    %cst_17 = arith.constant 6.28318548 : f32
    %39 = math.log %cst_17 : f32
    %cst_18 = arith.constant 5.000000e-01 : f32
    %40 = arith.mulf %cst_18, %39 : f32
    %41 = vector.broadcast %40 : f32 to vector<8x20xf32>
    %42 = arith.subf %38, %41 : vector<8x20xf32>
    %cst_19 = arith.constant dense<0.000000e+00> : vector<8xf32>
    %43 = vector.multi_reduction <add>, %42, %cst_19 [1] : vector<8x20xf32> to vector<8xf32>
    %44 = vector.shape_cast %43 : vector<8xf32> to vector<8x1xf32>
    %c288 = arith.constant 288 : index
    %c0_20 = arith.constant 0 : index
    %45 = vector.load %arg2[%c288, %c0_20] : memref<488x128xf32, #tpu.memory_space<vmem>>, vector<20x32xf32>
    %cst_21 = arith.constant dense<0.000000e+00> : vector<8x32xf32>
    %46 = tpu.matmul %34, %45, %cst_21 {dimension_numbers = #tpu.dot_dimension_numbers<[1], [0], [0], [1], [0, 0, 1, 1], [], []>} : vector<8x20xf32>, vector<20x32xf32>, vector<8x32xf32> -> vector<8x32xf32>
    %47 = vector.extract_strided_slice %20 {offsets = [0, 32], sizes = [8, 32], strides = [1, 1]} : vector<8x128xf32> to vector<8x32xf32>
    %48 = arith.addf %46, %47 : vector<8x32xf32>
    %cst_22 = arith.constant 0.000000e+00 : f32
    %49 = vector.broadcast %cst_22 : f32 to vector<8x32xf32>
    %50 = arith.maximumf %48, %49 : vector<8x32xf32>
    %c344 = arith.constant 344 : index
    %c0_23 = arith.constant 0 : index
    %51 = vector.load %arg2[%c344, %c0_23] : memref<488x128xf32, #tpu.memory_space<vmem>>, vector<32x40xf32>
    %cst_24 = arith.constant dense<0.000000e+00> : vector<8x40xf32>
    %52 = tpu.matmul %50, %51, %cst_24 {dimension_numbers = #tpu.dot_dimension_numbers<[1], [0], [0], [1], [0, 0, 1, 1], [], []>} : vector<8x32xf32>, vector<32x40xf32>, vector<8x40xf32> -> vector<8x40xf32>
    %c441 = arith.constant 441 : index
    %c0_25 = arith.constant 0 : index
    %53 = vector.load %arg2[%c441, %c0_25] : memref<488x128xf32, #tpu.memory_space<vmem>>, vector<1x40xf32>
    %54 = vector.broadcast %53 : vector<1x40xf32> to vector<8x40xf32>
    %55 = arith.addf %52, %54 : vector<8x40xf32>
    %56 = vector.extract_strided_slice %55 {offsets = [0, 0], sizes = [8, 20], strides = [1, 1]} : vector<8x40xf32> to vector<8x20xf32>
    %57 = vector.extract_strided_slice %55 {offsets = [0, 20], sizes = [8, 20], strides = [1, 1]} : vector<8x40xf32> to vector<8x20xf32>
    %58 = math.exp %57 : vector<8x20xf32>
    %59 = arith.mulf %34, %58 : vector<8x20xf32>
    %60 = arith.addf %59, %56 : vector<8x20xf32>
    %cst_26 = arith.constant dense<0.000000e+00> : vector<8xf32>
    %61 = vector.multi_reduction <add>, %57, %cst_26 [1] : vector<8x20xf32> to vector<8xf32>
    %62 = vector.shape_cast %61 : vector<8xf32> to vector<8x1xf32>
    %63 = arith.subf %44, %62 : vector<8x1xf32>
    %c288_27 = arith.constant 288 : index
    %c32 = arith.constant 32 : index
    %64 = vector.load %arg2[%c288_27, %c32] : memref<488x128xf32, #tpu.memory_space<vmem>>, vector<20x32xf32>
    %cst_28 = arith.constant dense<0.000000e+00> : vector<8x32xf32>
    %65 = tpu.matmul %60, %64, %cst_28 {dimension_numbers = #tpu.dot_dimension_numbers<[1], [0], [0], [1], [0, 0, 1, 1], [], []>} : vector<8x20xf32>, vector<20x32xf32>, vector<8x32xf32> -> vector<8x32xf32>
    %66 = vector.extract_strided_slice %20 {offsets = [0, 64], sizes = [8, 32], strides = [1, 1]} : vector<8x128xf32> to vector<8x32xf32>
    %67 = arith.addf %65, %66 : vector<8x32xf32>
    %cst_29 = arith.constant 0.000000e+00 : f32
    %68 = vector.broadcast %cst_29 : f32 to vector<8x32xf32>
    %69 = arith.maximumf %67, %68 : vector<8x32xf32>
    %c376 = arith.constant 376 : index
    %c0_30 = arith.constant 0 : index
    %70 = vector.load %arg2[%c376, %c0_30] : memref<488x128xf32, #tpu.memory_space<vmem>>, vector<32x40xf32>
    %cst_31 = arith.constant dense<0.000000e+00> : vector<8x40xf32>
    %71 = tpu.matmul %69, %70, %cst_31 {dimension_numbers = #tpu.dot_dimension_numbers<[1], [0], [0], [1], [0, 0, 1, 1], [], []>} : vector<8x32xf32>, vector<32x40xf32>, vector<8x40xf32> -> vector<8x40xf32>
    %c442 = arith.constant 442 : index
    %c0_32 = arith.constant 0 : index
    %72 = vector.load %arg2[%c442, %c0_32] : memref<488x128xf32, #tpu.memory_space<vmem>>, vector<1x40xf32>
    %73 = vector.broadcast %72 : vector<1x40xf32> to vector<8x40xf32>
    %74 = arith.addf %71, %73 : vector<8x40xf32>
    %75 = vector.extract_strided_slice %74 {offsets = [0, 0], sizes = [8, 20], strides = [1, 1]} : vector<8x40xf32> to vector<8x20xf32>
    %76 = vector.extract_strided_slice %74 {offsets = [0, 20], sizes = [8, 20], strides = [1, 1]} : vector<8x40xf32> to vector<8x20xf32>
    %77 = math.exp %76 : vector<8x20xf32>
    %78 = arith.mulf %60, %77 : vector<8x20xf32>
    %79 = arith.addf %78, %75 : vector<8x20xf32>
    %cst_33 = arith.constant dense<0.000000e+00> : vector<8xf32>
    %80 = vector.multi_reduction <add>, %76, %cst_33 [1] : vector<8x20xf32> to vector<8xf32>
    %81 = vector.shape_cast %80 : vector<8xf32> to vector<8x1xf32>
    %82 = arith.subf %63, %81 : vector<8x1xf32>
    %c288_34 = arith.constant 288 : index
    %c64 = arith.constant 64 : index
    %83 = vector.load %arg2[%c288_34, %c64] : memref<488x128xf32, #tpu.memory_space<vmem>>, vector<20x32xf32>
    %cst_35 = arith.constant dense<0.000000e+00> : vector<8x32xf32>
    %84 = tpu.matmul %79, %83, %cst_35 {dimension_numbers = #tpu.dot_dimension_numbers<[1], [0], [0], [1], [0, 0, 1, 1], [], []>} : vector<8x20xf32>, vector<20x32xf32>, vector<8x32xf32> -> vector<8x32xf32>
    %85 = vector.extract_strided_slice %20 {offsets = [0, 96], sizes = [8, 32], strides = [1, 1]} : vector<8x128xf32> to vector<8x32xf32>
    %86 = arith.addf %84, %85 : vector<8x32xf32>
    %cst_36 = arith.constant 0.000000e+00 : f32
    %87 = vector.broadcast %cst_36 : f32 to vector<8x32xf32>
    %88 = arith.maximumf %86, %87 : vector<8x32xf32>
    %c408 = arith.constant 408 : index
    %c0_37 = arith.constant 0 : index
    %89 = vector.load %arg2[%c408, %c0_37] : memref<488x128xf32, #tpu.memory_space<vmem>>, vector<32x40xf32>
    %cst_38 = arith.constant dense<0.000000e+00> : vector<8x40xf32>
    %90 = tpu.matmul %88, %89, %cst_38 {dimension_numbers = #tpu.dot_dimension_numbers<[1], [0], [0], [1], [0, 0, 1, 1], [], []>} : vector<8x32xf32>, vector<32x40xf32>, vector<8x40xf32> -> vector<8x40xf32>
    %c443 = arith.constant 443 : index
    %c0_39 = arith.constant 0 : index
    %91 = vector.load %arg2[%c443, %c0_39] : memref<488x128xf32, #tpu.memory_space<vmem>>, vector<1x40xf32>
    %92 = vector.broadcast %91 : vector<1x40xf32> to vector<8x40xf32>
    %93 = arith.addf %90, %92 : vector<8x40xf32>
    %94 = vector.extract_strided_slice %93 {offsets = [0, 0], sizes = [8, 20], strides = [1, 1]} : vector<8x40xf32> to vector<8x20xf32>
    %95 = vector.extract_strided_slice %93 {offsets = [0, 20], sizes = [8, 20], strides = [1, 1]} : vector<8x40xf32> to vector<8x20xf32>
    %96 = math.exp %95 : vector<8x20xf32>
    %97 = arith.mulf %79, %96 : vector<8x20xf32>
    %98 = arith.addf %97, %94 : vector<8x20xf32>
    %cst_40 = arith.constant dense<0.000000e+00> : vector<8xf32>
    %99 = vector.multi_reduction <add>, %95, %cst_40 [1] : vector<8x20xf32> to vector<8xf32>
    %100 = vector.shape_cast %99 : vector<8xf32> to vector<8x1xf32>
    %101 = arith.subf %82, %100 : vector<8x1xf32>
    %102 = vector.extract_strided_slice %0 {offsets = [0, 256], sizes = [8, 4], strides = [1, 1]} : vector<8x290xf32> to vector<8x4xf32>
    %c448 = arith.constant 448 : index
    %c0_41 = arith.constant 0 : index
    %103 = vector.load %arg2[%c448, %c0_41] : memref<488x128xf32, #tpu.memory_space<vmem>>, vector<4x20xf32>
    %cst_42 = arith.constant dense<0.000000e+00> : vector<8x20xf32>
    %104 = tpu.matmul %102, %103, %cst_42 {dimension_numbers = #tpu.dot_dimension_numbers<[1], [0], [0], [1], [0, 0, 1, 1], [], []>} : vector<8x4xf32>, vector<4x20xf32>, vector<8x20xf32> -> vector<8x20xf32>
    %c456 = arith.constant 456 : index
    %c0_43 = arith.constant 0 : index
    %105 = vector.load %arg2[%c456, %c0_43] : memref<488x128xf32, #tpu.memory_space<vmem>>, vector<20x20xf32>
    %cst_44 = arith.constant dense<0.000000e+00> : vector<8x20xf32>
    %106 = tpu.matmul %98, %105, %cst_44 {dimension_numbers = #tpu.dot_dimension_numbers<[1], [0], [0], [1], [0, 0, 1, 1], [], []>} : vector<8x20xf32>, vector<20x20xf32>, vector<8x20xf32> -> vector<8x20xf32>
    %107 = arith.addf %104, %106 : vector<8x20xf32>
    %c480 = arith.constant 480 : index
    %c0_45 = arith.constant 0 : index
    %108 = vector.load %arg2[%c480, %c0_45] : memref<488x128xf32, #tpu.memory_space<vmem>>, vector<1x20xf32>
    %109 = vector.broadcast %108 : vector<1x20xf32> to vector<8x20xf32>
    %110 = arith.addf %107, %109 : vector<8x20xf32>
    %c0_46 = arith.constant 0 : index
    %c0_47 = arith.constant 0 : index
    %111 = vector.load %arg3[%c0_46, %c0_47] : memref<8x128xf32, #tpu.memory_space<vmem>>, vector<8x20xf32>
    tpu.vector_store %arg3[%c0_46, %c0_47], %110 {strides = array<i32>} : memref<8x128xf32, #tpu.memory_space<vmem>>, vector<8x20xf32>,
    %c0_48 = arith.constant 0 : index
    %c20 = arith.constant 20 : index
    %112 = vector.load %arg3[%c0_48, %c20] : memref<8x128xf32, #tpu.memory_space<vmem>>, vector<8x1xf32>
    tpu.vector_store %arg3[%c0_48, %c20], %101 {strides = array<i32>} : memref<8x128xf32, #tpu.memory_space<vmem>>, vector<8x1xf32>,
    return
  }
}

</mosaic_0001>

<bundles_post_ra>
// kernel: _lambda_.1
= control target key start
LH: loop header
LB: loop body
LE: loop exit
PB: predicated region body
PF: predicated region fallthrough
CT: control target
= control target key end

     0   :  { %vm1662_vm0 = vmmov 0   ;;  %vm372_vm1 = vcmask 1045504   ;;  %vm1664_vm2 = vmmov 1   ;;  %vm368_vm4 = vcmask 113664   ;;  %s1665_s25 = smov 6   ;;  %s1666_s28 = smov 96   ;;  %s2087_s1 = inlined_call_operand.vmem [shape: bf16[256,256], index: 1, kind: input, shape index: {}]   ;;  %s2088_s0 = inlined_call_operand.vmem [shape: f32[8,290], index: 0, kind: input, shape index: {}]   ;;  %s2089_s2 = inlined_call_operand.vmem [shape: f32[488,128], index: 2, kind: input, shape index: {}]   ;;  %s2090_s3 = inlined_call_operand.vmem [shape: f32[8,128], index: 3, kind: output, shape index: {}]  }
   0x1   :  { %v1605_v0 = vld [vmem:[%s2087_s1 + $0x4] ss:$8 sps:$4 sm:$0xff]   ;;  %v1607_v1 = vld [vmem:[%s2087_s1] ss:$8 sps:$4 sm:$0xff]   ;;  %v1608_v2 = vld [vmem:[%s2087_s1 + $0x14] ss:$8 sps:$4 sm:$0xff]  }
   0x2   :  { %221 = vmatprep.subr.bf16.mxu0 %v1605_v0  ;;  %v1610_v3 = vld [vmem:[%s2087_s1 + $0x10] ss:$8 sps:$4 sm:$0xff]   ;;  %v1611_v4 = vld [vmem:[%s2087_s1 + $0x24] ss:$8 sps:$4 sm:$0xff]   ;;  %v1613_v5 = vld [vmem:[%s2087_s1 + $0x20] ss:$8 sps:$4 sm:$0xff]  }
   0x3   :  { %222 = vmatpush1.bf16.msra.mxu0 %v1607_v1  ;;  %v1614_v6 = vld [vmem:[%s2087_s1 + $0x34] ss:$8 sps:$4 sm:$0xff]   ;;  %v1616_v7 = vld [vmem:[%s2087_s1 + $0x30] ss:$8 sps:$4 sm:$0xff]   ;;  %v1617_v8 = vld [vmem:[%s2087_s1 + $0x44] ss:$8 sps:$4 sm:$0xff]  }
   0x4   :  { %223 = vmatprep.subr.bf16.mxu0 %v1608_v2  ;;  %v1619_v9 = vld [vmem:[%s2087_s1 + $0x40] ss:$8 sps:$4 sm:$0xff]   ;;  %v1620_v10 = vld [vmem:[%s2087_s1 + $0x54] ss:$8 sps:$4 sm:$0xff]   ;;  %v1622_v11 = vld [vmem:[%s2087_s1 + $0x50] ss:$8 sps:$4 sm:$0xff]  }
   0x5   :  { %v1623_v12 = vld [vmem:[%s2087_s1 + $0x64] ss:$8 sps:$4 sm:$0xff]   ;;  %v1625_v13 = vld [vmem:[%s2087_s1 + $0x60] ss:$8 sps:$4 sm:$0xff]   ;;  %v1626_v15 = vld [vmem:[%s2087_s1 + $0x74] ss:$8 sps:$4 sm:$0xff]  }
   0x6   :  { %v15_v14 = vld [vmem:[%s2088_s0 + $0x8] sm:$0xff]  ;;  %v282_v17 = vld [vmem:[%s2089_s2 + $0x90] sm:$0xff]  ;;  %v283_v18 = vld [vmem:[%s2089_s2 + $0x98] sm:$0xff]  ;;  %vm462_vm5 = vcmask 261120   ;;  %vm573_vm6 = vcmask 1043456   ;;  %s1667_s9 = smov 108  }
   0x7   :  { %224 = vmatpush1.bf16.msra.mxu0 %v1610_v3  ;;  %v20_v16 = vpack.c.bf16 %v15_v14, %v15_v14  ;;  %v1512_v19 = vpack.c.bf16 %v283_v18, %v282_v17  ;;  %v266_v20 = vld [vmem:[%s2089_s2 + $0x10] sm:$0xff]  ;;  %v267_v21 = vld [vmem:[%s2089_s2 + $0x18] sm:$0xff]  ;;  %v284_v22 = vld [vmem:[%s2089_s2 + $0xa0] sm:$0xff]  ;;  %vm559_vm7 = vcmask 162816   ;;  %s1668_s23 = smov 64   ;;  %s1669_s30 = smov 32  }
   0x8   :  { %225 = vmatprep.subr.bf16.mxu0 %v1611_v4  ;;  %v1514_v23 = vpack.c.bf16 %v267_v21, %v266_v20  ;;  %v285_v24 = vld [vmem:[%s2089_s2 + $0xa8] sm:$0xff]  ;;  %v268_v25 = vld [vmem:[%s2089_s2 + $0x20] sm:$0xff]  ;;  %v286_v28 = vld [vmem:[%s2089_s2 + $0xb0] sm:$0xff]  ;;  %v1661_v20 = vmov 0.0|0.0   ;;  %v1663_v21 = vmov 0.0   ;;  %s1670_s4 = smov 122  }
   0x9   :  { %253 = vmatprep.mubr.bf16.mxu0 %v20_v16  ;;  %v269_v26 = vld [vmem:[%s2089_s2 + $0x28] sm:$0xff]  ;;  %1513 = vmatprep.subr.bf16.mxu1 %v1512_v19  ;;  %v1516_v27 = vpack.c.bf16 %v285_v24, %v284_v22  ;;  %v287_v29 = vld [vmem:[%s2089_s2 + $0xb8] sm:$0xff]  ;;  %v270_v33 = vld [vmem:[%s2089_s2 + $0x30] sm:$0xff]  ;;  %s1671_s21 = smov 114   ;;  %vm1198_vm8 = vcmask 31744   ;;  %vm1281_vm9 = vcmask 171168  }
   0xa   :  { %1515 = vmatpush3.bf16.msra.mxu1 %v1514_v23  ;;  %v1518_v30 = vpack.c.bf16 %v269_v26, %v268_v25  ;;  %v1628_v31 = vld [vmem:[%s2087_s1 + $0x70] ss:$8 sps:$4 sm:$0xff]   ;;  %v1520_v32 = vpack.c.bf16 %v287_v29, %v286_v28  ;;  %v1629_v35 = vld [vmem:[%s2087_s1 + $0x84] ss:$8 sps:$4 sm:$0xff]   ;;  %v1631_v39 = vld [vmem:[%s2087_s1 + $0x80] ss:$8 sps:$4 sm:$0xff]  }
   0xb   :  { %226 = vmatpush1.bf16.msra.mxu0 %v1613_v5  ;;  %1517 = vmatprep.subr.bf16.mxu1 %v1516_v27  ;;  %v271_v34 = vld [vmem:[%s2089_s2 + $0x38] sm:$0xff]  ;;  %v288_v36 = vld [vmem:[%s2089_s2 + $0xc0] sm:$0xff]  ;;  %v289_v37 = vld [vmem:[%s2089_s2 + $0xc8] sm:$0xff] }
   0xc   :  { %227 = vmatprep.subr.bf16.mxu0 %v1614_v6  ;;  %v1522_v38 = vpack.c.bf16 %v271_v34, %v270_v33  ;;  %v1524_v40 = vpack.c.bf16 %v289_v37, %v288_v36  ;;  %v272_v41 = vld [vmem:[%s2089_s2 + $0x40] sm:$0xff]  ;;  %v273_v42 = vld [vmem:[%s2089_s2 + $0x48] sm:$0xff]  ;;  %v1632_v43 = vld [vmem:[%s2087_s1 + $0x94] ss:$8 sps:$4 sm:$0xff]  }
   0xd   :  { %v290_v44 = vld [vmem:[%s2089_s2 + $0xd0] sm:$0xff]  ;;  %v291_v45 = vld [vmem:[%s2089_s2 + $0xd8] sm:$0xff]  ;;  %v1526_v46 = vpack.c.bf16 %v273_v42, %v272_v41  ;;  %v1635_v51 = vld [vmem:[%s2087_s1 + $0xa4] ss:$8 sps:$4 sm:$0xff]  }
   0xe   :  { %1519 = vmatpush3.bf16.msra.mxu1 %v1518_v30  ;;  %v1634_v47 = vld [vmem:[%s2087_s1 + $0x90] ss:$8 sps:$4 sm:$0xff]   ;;  %v1528_v48 = vpack.c.bf16 %v291_v45, %v290_v44  ;;  %v292_v52 = vld [vmem:[%s2089_s2 + $0xe0] sm:$0xff]  ;;  %v293_v53 = vld [vmem:[%s2089_s2 + $0xe8] sm:$0xff] }
   0xf   :  { %228 = vmatpush1.bf16.msra.mxu0 %v1616_v7  ;;  %1521 = vmatprep.subr.bf16.mxu1 %v1520_v32  ;;  %v274_v49 = vld [vmem:[%s2089_s2 + $0x50] sm:$0xff]  ;;  %v275_v50 = vld [vmem:[%s2089_s2 + $0x58] sm:$0xff]  ;;  %v1637_v55 = vld [vmem:[%s2087_s1 + $0xa0] ss:$8 sps:$4 sm:$0xff]   ;;  %v1532_v56 = vpack.c.bf16 %v293_v53, %v292_v52 }
  0x10   :  { %229 = vmatprep.subr.bf16.mxu0 %v1617_v8  ;;  %v1530_v54 = vpack.c.bf16 %v275_v50, %v274_v49  ;;  %v276_v57 = vld [vmem:[%s2089_s2 + $0x60] sm:$0xff]  ;;  %v277_v58 = vld [vmem:[%s2089_s2 + $0x68] sm:$0xff]  ;;  %v1638_v59 = vld [vmem:[%s2087_s1 + $0xb4] ss:$8 sps:$4 sm:$0xff]  }
  0x11   :  { %v294_v60 = vld [vmem:[%s2089_s2 + $0xf0] sm:$0xff]  ;;  %v295_v61 = vld [vmem:[%s2089_s2 + $0xf8] sm:$0xff]  ;;  %v1534_v62 = vpack.c.bf16 %v277_v58, %v276_v57  ;;  %v1641_v3 = vld [vmem:[%s2087_s1 + $0xc4] ss:$8 sps:$4 sm:$0xff]  }
  0x12   :  { %1523 = vmatpush3.bf16.msra.mxu1 %v1522_v38  ;;  %v1640_v63 = vld [vmem:[%s2087_s1 + $0xb0] ss:$8 sps:$4 sm:$0xff]   ;;  %v1536_v0 = vpack.c.bf16 %v295_v61, %v294_v60  ;;  %v1643_v5 = vld [vmem:[%s2087_s1 + $0xc0] ss:$8 sps:$4 sm:$0xff]   ;;  %v1644_v6 = vld [vmem:[%s2087_s1 + $0xd4] ss:$8 sps:$4 sm:$0xff]  }
  0x13   :  { %230 = vmatpush1.bf16.msra.mxu0 %v1619_v9  ;;  %1525 = vmatprep.subr.bf16.mxu1 %v1524_v40  ;;  %v278_v1 = vld [vmem:[%s2089_s2 + $0x70] sm:$0xff]  ;;  %v279_v2 = vld [vmem:[%s2089_s2 + $0x78] sm:$0xff]  ;;  %v1647_v8 = vld [vmem:[%s2087_s1 + $0xe4] ss:$8 sps:$4 sm:$0xff]  }
  0x14   :  { %231 = vmatprep.subr.bf16.mxu0 %v1620_v10  ;;  %v1538_v4 = vpack.c.bf16 %v279_v2, %v278_v1  ;;  %v1646_v7 = vld [vmem:[%s2087_s1 + $0xd0] ss:$8 sps:$4 sm:$0xff]   ;;  %v1649_v9 = vld [vmem:[%s2087_s1 + $0xe0] ss:$8 sps:$4 sm:$0xff]   ;;  %v1650_v10 = vld [vmem:[%s2087_s1 + $0xf4] ss:$8 sps:$4 sm:$0xff]  }
  0x15   :  { %v296_v14 = vld [vmem:[%s2089_s2 + $0x100] sm:$0xff]  ;;  %v281_v18 = vld [vmem:[%s2089_s2 + $0x88] sm:$0xff]  ;;  %v1287_v22 = vld [vmem:[%s2089_s2 + $0x118] ss:$0 sm:$0xff] }
  0x16   :  { %1527 = vmatpush3.bf16.msra.mxu1 %v1526_v46  ;;  %v280_v17 = vld [vmem:[%s2089_s2 + $0x80] sm:$0xff]  ;;  %v1288_v23 = vld [vmem:[%s2089_s2 + $0x119] ss:$0 sm:$0xff]  ;;  %v265_v28 = vld [vmem:[%s2089_s2 + $0x8] sm:$0x3f] }
  0x17   :  { %232 = vmatpush1.bf16.msra.mxu0 %v1622_v11  ;;  %1529 = vmatprep.subr.bf16.mxu1 %v1528_v48  ;;  %v1652_v11 = vld [vmem:[%s2087_s1 + $0xf0] ss:$8 sps:$4 sm:$0xff]   ;;  %v1542_v19 = vpack.c.bf16 %v281_v18, %v280_v17  ;;  %v264_v27 = vld [vmem:[%s2089_s2] sm:$0xff]  ;;  %vm1546_vm3 = vmpackc.low %vm372_vm1, %vm1664_vm2 }
  0x18   :  { %233 = vmatprep.subr.bf16.mxu0 %v1623_v12  ;;  %v14_v12 = vld [vmem:[%s2088_s0] sm:$0xff]  ;;  %v1545_v33 = vpack.c.bf16 %v265_v28, %v264_v27  ;;  %v453_v36 = vld [vmem:[%s2089_s2 + $0x138] sm:$0xff]  ;;  %v456_v40 = vld [vmem:[%s2089_s2 + $0x150] sm:$0xff] }
  0x19   :  { %v454_v37 = vld [vmem:[%s2089_s2 + $0x140] sm:$0xff]  ;;  %v1323_v46 = vld [vmem:[%s2089_s2 + $0x110] ss:$0 sm:$0xff]  ;;  %v564_v52 = vld [vmem:[%s2089_s2 + $0x128] sm:$0xff] }
  0x1a   :  { %1531 = vmatpush3.bf16.msra.mxu1 %v1530_v54  ;;  %v1549_v38 = vpack.c.bf16 %v454_v37, %v453_v36  ;;  %v1324_v54 = vld [vmem:[%s2089_s2 + $0x1b8] ss:$0 sm:$0xff]  ;;  %v1329_v17 = vld [vmem:[%s2089_s2 + $0x1b9] ss:$0 sm:$0xff] }
  0x1b   :  { %234 = vmatpush1.bf16.msra.mxu0 %v1625_v13  ;;  %1533 = vmatprep.subr.bf16.mxu1 %v1532_v56  ;;  %v19_v13 = vpack.c.bf16 %v14_v12, %v14_v12 }
  0x1c   :  { %235 = vmatprep.subr.bf16.mxu0 %v1626_v15  ;;  %v297_v15 = vld [vmem:[%s2089_s2 + $0x108] sm:$0xff] }
  0x1d   :  { %v1540_v16 = vpack.c.bf16 %v297_v15, %v296_v14 }
  0x1e   :  { %1535 = vmatpush3.bf16.msra.mxu1 %v1534_v62 }
  0x1f   :  { %236 = vmatpush1.bf16.msra.mxu0 %v1628_v31  ;;  %1537 = vmatprep.subr.bf16.mxu1 %v1536_v0  ;;  %v649_v0 = vld [vmem:[%s2089_s2 + $0x160] sm:$0xff] }
  0x20   :  { %237 = vmatprep.subr.bf16.mxu0 %v1629_v35  ;;  %v1909_v35 = vld [vmem:[%s2088_s0 + $0x10] sm:$0xff] }
  0x21   :  { %538 = vrot.lane.b32.xlu0 %v1909_v35, %s1665_s25 }
  0x22   :  { %1539 = vmatpush3.bf16.msra.mxu1 %v1538_v4  ;;  %v650_v4 = vld [vmem:[%s2089_s2 + $0x168] sm:$0xff] }
  0x23   :  { %238 = vmatpush1.bf16.msra.mxu0 %v1631_v39  ;;  %1541 = vmatprep.subr.bf16.mxu1 %v1540_v16  ;;  %v455_v39 = vld [vmem:[%s2089_s2 + $0x148] sm:$0xff] }
  0x24   :  { %239 = vmatprep.subr.bf16.mxu0 %v1632_v43  ;;  %v1552_v41 = vpack.c.bf16 %v456_v40, %v455_v39 }
  0x26   :  { %1543 = vmatpush3.bf16.msra.mxu1 %v1542_v19 }
  0x27   :  { %240 = vmatpush1.bf16.msra.mxu0 %v1634_v47  ;;  %1544 = vmatprep.subr.bf16.mxu1 %v1661_v20 }
  0x28   :  { %241 = vmatprep.subr.bf16.mxu0 %v1635_v51  ;;  %v563_v51 = vld [vmem:[%s2089_s2 + $0x120] sm:$0xff] }
  0x29   :  { %v1555_v53 = vpack.c.bf16 %v564_v52, %v563_v51  ;;  %v1595_v12 = vpack.i.bf16 %v564_v52, %v563_v51 }
  0x2b   :  { %242 = vmatpush1.bf16.msra.mxu0 %v1637_v55 }
  0x2c   :  { %243 = vmatprep.subr.bf16.mxu0 %v1638_v59  ;;  %v1959_v59 = vld [vmem:[%s2089_s2 + $0x130] sm:$0xf] }
  0x2f   :  { %244 = vmatpush1.bf16.msra.mxu0 %v1640_v63  ;;  %v648_v63 = vld [vmem:[%s2089_s2 + $0x158] sm:$0xff] }
  0x30   :  { %245 = vmatprep.subr.bf16.mxu0 %v1641_v3  ;;  %v1558_v2 = vpack.c.bf16 %v649_v0, %v648_v63 }
  0x33   :  { %246 = vmatpush1.bf16.msra.mxu0 %v1643_v5  ;;  %v651_v5 = vld [vmem:[%s2089_s2 + $0x170] sm:$0xff] }
  0x34   :  { %247 = vmatprep.subr.bf16.mxu0 %v1644_v6  ;;  %v1561_v6 = vpack.c.bf16 %v651_v5, %v650_v4  ;;  %v1337_v4 = vld [vmem:[%s2089_s2 + $0x1bb] ss:$0 sm:$0xff] }
  0x37   :  { %248 = vmatpush1.bf16.msra.mxu0 %v1646_v7 }
  0x38   :  { %249 = vmatprep.subr.bf16.mxu0 %v1647_v8 }
  0x3b   :  { %250 = vmatpush1.bf16.msra.mxu0 %v1649_v9 }
  0x3c   :  { %251 = vmatprep.subr.bf16.mxu0 %v1650_v10 }
  0x3f   :  { %252 = vmatpush1.bf16.msra.mxu0 %v1652_v11 }
  0x40   :  { %1566 = vmatprep.subr.bf16.mxu0 %v1661_v20 }
  0x42   :  { %254 = vmatmul.mubr.bf16.vlgmr.msra.gmra.mrb[0].mxu0 %v19_v13 }
  0x43   :  { %1475 = vmatprep.mubr.msk.f32.mxu0 %vm1662_vm0, %v1663_v21 }
  0x93   :  { %v539_v60 = vpop.permute.xlu0 %538 }
 0x115   :  { %v255_v24 = vpop.f32.mrb[0].mxu0 }
 0x116   :  { %v256_v25 = vadd.f32 %v1287_v22, %v255_v24  ;;  %v257_v26 = vpop.f32.mrb[1].mxu0 }
 0x117   :  { %v259_v29 = vpop.f32.mrb[2].mxu0  ;;  %v258_v30 = vadd.f32 %v1288_v23, %v257_v26  ;;  %v836_v26 = vld [vmem:[%s2089_s2 + $0x180] sm:$0xff] }
 0x118   :  { %v260_v31 = vpop.f32.mrb[3].mxu0  ;;  %v262_v34 = vmax.f32 %v256_v25, 0.0  ;;  %v835_v25 = vld [vmem:[%s2089_s2 + $0x178] sm:$0xff] }
 0x119   :  { %v263_v32 = vmax.f32 %v258_v30, 0.0  ;;  %v1567_v27 = vpack.c.bf16 %v836_v26, %v835_v25 }
 0x11b   :  { %362 = vmatprep.mubr.f32.mxu1 %v263_v32  ;;  %1568 = vmatpush3.bf16.msra.mxu0 %v1567_v27  ;;  %v837_v32 = vld [vmem:[%s2089_s2 + $0x188] sm:$0xff] }
 0x11c   :  { %363 = vmatmul.mubr.f32.vlgmr.msra.gmra.mrb[0].mxu1 %v262_v34  ;;  %1569 = vmatprep.subr.bf16.mxu0 %v1661_v20 }
 0x11d   :  { %1547 = vmatpush3.bf16.msk.msra.mxu1 %vm1546_vm3, %v1545_v33  ;;  %1424 = vmatprep.mubr.msk.f32.mxu1 %vm1662_vm0, %v1663_v21  ;;  %v838_v33 = vld [vmem:[%s2089_s2 + $0x190] sm:$0xff] }
 0x11e   :  { %1548 = vmatprep.subr.bf16.mxu1 %v1661_v20  ;;  %v1570_v34 = vpack.c.bf16 %v838_v33, %v837_v32 }
 0x120   :  { %1425 = vmatmul.mubr.msk.f32.vlgmr.msra.gmra.mrb[2].mxu1 %vm368_vm4, %v1909_v35  ;;  %1571 = vmatpush3.bf16.msra.mxu0 %v1570_v34 }
 0x121   :  { %1435 = vmatprep.mubr.msk.f32.mxu1 %vm1662_vm0, %v1663_v21  ;;  %1550 = vmatpush3.bf16.msra.mxu1 %v1549_v38 }
 0x122   :  { %1551 = vmatprep.subr.bf16.mxu1 %v1661_v20  ;;  %1581 = vmatprep.subr.bf16.mxu0 %v1661_v20 }
 0x125   :  { %1553 = vmatpush3.bf16.msra.mxu1 %v1552_v41 }
 0x126   :  { %1554 = vmatprep.subr.bf16.mxu1 %v1661_v20 }
 0x1ef   :  { %v1376_v42 = vpop.f32.mrb[0].mxu1 }
 0x1f0   :  { %v1377_v43 = vpop.f32.mrb[1].mxu1 }
 0x1f1   :  { %v1378_v44 = vadd.f32 %v1377_v43, %v1376_v42 }
 0x1f3   :  { %v442_v45 = vpop.f32.mrb[2].mxu1 }
 0x1f4   :  { %v443_v47 = vadd.f32 %v1378_v44, %v442_v45  ;;  %v1426_v48 = vpop.f32.mrb[3].mxu1  ;;  %v1333_v45 = vld [vmem:[%s2089_s2 + $0x1ba] ss:$0 sm:$0xff] }
 0x1f6   :  { %v1935_v49 = vadd.f32 %v1323_v46, %v443_v47 }
 0x1f8   :  { %v452_v50 = vmax.f32 %v1935_v49, 0.0  ;;  %567 = vrot.lane.b32.xlu1 %v1935_v49, %s1666_s28 }
 0x1fa   :  { %1436 = vmatmul.mubr.msk.f32.vlgmr.msra.gmra.mrb[4].mxu1 %vm462_vm5, %v452_v50 }
 0x1fb   :  { %1444 = vmatprep.mubr.msk.f32.mxu1 %vm1662_vm0, %v1663_v21  ;;  %1556 = vmatpush3.bf16.msra.mxu1 %v1555_v53  ;;  %v1020_v53 = vld [vmem:[%s2089_s2 + $0x198] sm:$0xff] }
 0x1fc   :  { %1442 = vmatprep.subr.mxu1 %v1663_v21  ;;  %1596 = vrot.lane.b32.xlu1 %v1595_v12, %s1666_s28 }
 0x1ff   :  { %1443 = vmatpush3.msk.msra.mxu1 %vm573_vm6, %v1959_v59 }
 0x200   :  { %1557 = vmatprep.subr.bf16.mxu1 %v1661_v20  ;;  %752 = vrot.lane.b32.xlu1 %v1959_v59, %s1666_s28 }
 0x204   :  { %1601 = vrot.lane.b32.xlu1 %v1595_v12, %s1668_s23 }
 0x208   :  { %937 = vrot.lane.b32.xlu1 %v1959_v59, %s1668_s23 }
 0x26a   :  { %v568_v7 = vpop.permute.xlu1 %567 }
 0x26e   :  { %v1597_v13 = vpop.permute.xlu1 %1596 }
 0x26f   :  { %v1599_v14 = vunpack.i.h.bf16 %v1597_v13  ;;  %v1598_v15 = vunpack.i.l.bf16 %v1597_v13 }
 0x271   :  { %v1564_v16 = vpack.c.bf16 %v1599_v14, %v1598_v15 }
 0x272   :  { %v753_v24 = vpop.permute.xlu1 %752 }
 0x276   :  { %v1602_v41 = vpop.permute.xlu1 %1601 }
 0x277   :  { %v1604_v42 = vunpack.i.h.bf16 %v1602_v41  ;;  %v1603_v43 = vunpack.i.l.bf16 %v1602_v41 }
 0x279   :  { %v1573_v44 = vpack.c.bf16 %v1604_v42, %v1603_v43 }
 0x27a   :  { %v938_v51 = vpop.permute.xlu1 %937 }
 0x2cd   :  { %v532_v55 = vpop.f32.mrb[4].mxu1 }
 0x2ce   :  { %v1953_v56 = vadd.f32 %v1324_v54, %v532_v55  ;;  %v1437_v57 = vpop.f32.mrb[5].mxu1  ;;  %v1021_v54 = vld [vmem:[%s2089_s2 + $0x1a0] sm:$0xff] }
 0x2d0   :  { %v536_v58 = vmul.f32 1.442695, %v1953_v56 }
 0x2d2   :  { %1653 = vpow2.f32 %v536_v58  ;;  %v1576_v58 = vpack.c.bf16 %v1021_v54, %v1020_v53 }
 0x2dc   :  { %v1654_v61 = vpop.eup %1653 }
 0x2dd   :  { %v541_v62 = vmul.f32 %v1654_v61, %v539_v60 }
 0x2df   :  { %543 = vrot.lane.b32.xlu0 %v541_v62, %s1667_s9 }
 0x351   :  { %v544_v1 = vpop.permute.xlu0 %543 }
 0x352   :  { %v546_v3 = vadd.f32 %v544_v1, %v1953_v56 }
 0x354   :  { %1445 = vmatmul.mubr.msk.f32.vlgmr.msra.gmra.mrb[6].mxu1 %vm559_vm7, %v546_v3 }
 0x355   :  { %1559 = vmatpush3.bf16.msra.mxu1 %v1558_v2  ;;  %1455 = vmatprep.mubr.msk.f32.mxu1 %vm1662_vm0, %v1663_v21  ;;  %v1120_v2 = vld [vmem:[%s2089_s2 + $0x1d0] sm:$0xff] }
 0x356   :  { %1560 = vmatprep.subr.bf16.mxu1 %v1661_v20 }
 0x359   :  { %1562 = vmatpush3.bf16.msra.mxu1 %v1561_v6 }
 0x35a   :  { %1563 = vmatprep.subr.bf16.mxu1 %v1661_v20 }
 0x427   :  { %v643_v8 = vpop.f32.mrb[6].mxu1 }
 0x428   :  { %v644_v9 = vadd.f32 %v643_v8, %v568_v7  ;;  %v1446_v10 = vpop.f32.mrb[7].mxu1 }
 0x429   :  { %v547_v10 = vmul.f32 -0.5, %v1909_v35 }
 0x42a   :  { %v647_v11 = vmax.f32 %v644_v9, 0.0  ;;  %v1121_v9 = vld [vmem:[%s2089_s2 + $0x1d8] sm:$0xf] }
 0x42c   :  { %1456 = vmatmul.mubr.msk.f32.vlgmr.msra.gmra.mrb[8].mxu1 %vm462_vm5, %v647_v11  ;;  %v548_v11 = vmul.f32 %v547_v10, %v1909_v35 }
 0x42d   :  { %1464 = vmatprep.mubr.msk.f32.mxu1 %vm1662_vm0, %v1663_v21  ;;  %1565 = vmatpush3.bf16.msra.mxu1 %v1564_v16 }
 0x42e   :  { %1462 = vmatprep.subr.mxu1 %v1663_v21 }
 0x431   :  { %1463 = vmatpush3.msk.msra.mxu1 %vm573_vm6, %v753_v24 }
 0x432   :  { %1572 = vmatprep.subr.bf16.mxu1 %v1661_v20 }
 0x4ff   :  { %v726_v18 = vpop.f32.mrb[8].mxu1 }
 0x500   :  { %v727_v19 = vadd.f32 %v1329_v17, %v726_v18  ;;  %v1457_v22 = vpop.f32.mrb[9].mxu1 }
 0x502   :  { %v730_v23 = vmul.f32 1.442695, %v727_v19 }
 0x504   :  { %1655 = vpow2.f32 %v730_v23  ;;  %v1118_v23 = vld [vmem:[%s2089_s2 + $0x1c0] sm:$0xf] }
 0x50e   :  { %v1656_v28 = vpop.eup %1655 }
 0x50f   :  { %733 = vrot.lane.b32.xlu0 %v1656_v28, %s1667_s9 }
 0x513   :  { %756 = vrot.lane.b32.xlu0 %v1935_v49, %s1668_s23 }
 0x581   :  { %v734_v29 = vpop.permute.xlu0 %733 }
 0x582   :  { %v736_v30 = vmul.f32 %v734_v29, %v546_v3 }
 0x584   :  { %v737_v31 = vadd.f32 %v736_v30, %v727_v19 }
 0x585   :  { %v757_v36 = vpop.permute.xlu0 %756 }
 0x586   :  { %1465 = vmatmul.mubr.msk.f32.vlgmr.msra.gmra.mrb[10].mxu1 %vm559_vm7, %v737_v31 }
 0x587   :  { %1484 = vmatprep.mubr.msk.f32.mxu1 %vm1662_vm0, %v1663_v21  ;;  %1574 = vmatpush3.bf16.msra.mxu1 %v1573_v44 }
 0x588   :  { %1482 = vmatprep.subr.mxu1 %v1663_v21 }
 0x58b   :  { %1483 = vmatpush3.msk.msra.mxu1 %vm573_vm6, %v938_v51 }
 0x58c   :  { %1575 = vmatprep.subr.bf16.mxu1 %v1661_v20 }
 0x659   :  { %v830_v37 = vpop.f32.mrb[10].mxu1 }
 0x65a   :  { %v831_v38 = vadd.f32 %v830_v37, %v757_v36  ;;  %v1466_v39 = vpop.f32.mrb[11].mxu1 }
 0x65c   :  { %v834_v40 = vmax.f32 %v831_v38, 0.0 }
 0x65e   :  { %1476 = vmatmul.mubr.msk.f32.vlgmr.msra.gmra.mrb[4].mxu0 %vm462_vm5, %v834_v40 }
 0x65f   :  { %1504 = vmatprep.mubr.msk.f32.mxu0 %vm1662_vm0, %v1663_v21 }
 0x731   :  { %v913_v46 = vpop.f32.mrb[4].mxu0 }
 0x732   :  { %v914_v47 = vadd.f32 %v1333_v45, %v913_v46  ;;  %v1477_v48 = vpop.f32.mrb[5].mxu0 }
 0x734   :  { %v917_v50 = vmul.f32 1.442695, %v914_v47 }
 0x736   :  { %1657 = vpow2.f32 %v917_v50 }
 0x740   :  { %v1658_v52 = vpop.eup %1657 }
 0x741   :  { %920 = vrot.lane.b32.xlu0 %v1658_v52, %s1667_s9 }
 0x745   :  { %941 = vrot.lane.b32.xlu0 %v1935_v49, %s1669_s30  ;;  %v1022_v49 = vld [vmem:[%s2089_s2 + $0x1a8] sm:$0xff] }
 0x749   :  { %550 = vrot.lane.b32.xlu0 %v1953_v56, %s1670_s4  ;;  %v1023_v56 = vld [vmem:[%s2089_s2 + $0x1b0] sm:$0xff] }
 0x74a   :  { %v1579_v60 = vpack.c.bf16 %v1023_v56, %v1022_v49 }
 0x74d   :  { %739 = vrot.lane.b32.xlu0 %v727_v19, %s1667_s9 }
 0x7b3   :  { %v921_v55 = vpop.permute.xlu0 %920 }
 0x7b4   :  { %v923_v57 = vmul.f32 %v921_v55, %v737_v31 }
 0x7b6   :  { %v924_v59 = vadd.f32 %v923_v57, %v914_v47 }
 0x7b7   :  { %v942_v61 = vpop.permute.xlu0 %941 }
 0x7b8   :  { %1485 = vmatmul.mubr.msk.f32.vlgmr.msra.gmra.mrb[12].mxu1 %vm559_vm7, %v924_v59 }
 0x7b9   :  { %1577 = vmatpush3.bf16.msra.mxu1 %v1576_v58  ;;  %1495 = vmatprep.mubr.msk.f32.mxu1 %vm1662_vm0, %v1663_v21 }
 0x7ba   :  { %1578 = vmatprep.subr.bf16.mxu1 %v1661_v20  ;;  %v1119_v20 = vld [vmem:[%s2089_s2 + $0x1c8] sm:$0xff] }
 0x7bb   :  { %v1582_v3 = vpack.c.bf16 %v1120_v2, %v1119_v20  ;;  %v551_v12 = vpop.permute.xlu0 %550 }
 0x7bc   :  { %v553_v13 = vsub.f32 %v548_v11, %v551_v12 }
 0x7bd   :  { %1580 = vmatpush3.bf16.msra.mxu1 %v1579_v60  ;;  %1583 = vmatpush3.bf16.msra.mxu0 %v1582_v3 }
 0x7be   :  { %1502 = vmatprep.subr.mxu0 %v1663_v21  ;;  %v1326_v15 = vadd.f32 -0.9189385, %v553_v13 }
 0x7bf   :  { %v740_v16 = vpop.permute.xlu0 %739 }
 0x7c0   :  { %v742_v17 = vsel %vm559_vm7, %v740_v16, 0.0 }
 0x7c1   :  { %1503 = vmatpush3.msk.msra.mxu0 %vm573_vm6, %v1121_v9 }
 0x7c2   :  { %1507 = vmatprep.subr.mxu0 %v1663_v21 }
 0x88b   :  { %v1015_v62 = vpop.f32.mrb[12].mxu1 }
 0x88c   :  { %v1016_v63 = vadd.f32 %v1015_v62, %v942_v61  ;;  %v1486_v0 = vpop.f32.mrb[13].mxu1 }
 0x88e   :  { %v1019_v1 = vmax.f32 %v1016_v63, 0.0 }
 0x890   :  { %1496 = vmatmul.mubr.msk.f32.vlgmr.msra.gmra.mrb[14].mxu1 %vm462_vm5, %v1019_v1 }
 0x963   :  { %v1098_v5 = vpop.f32.mrb[14].mxu1 }
 0x964   :  { %v1099_v6 = vadd.f32 %v1337_v4, %v1098_v5  ;;  %v1497_v7 = vpop.f32.mrb[15].mxu1 }
 0x966   :  { %v1102_v8 = vmul.f32 1.442695, %v1099_v6  ;;  %1111 = vrot.lane.b32.xlu0 %v1099_v6, %s1667_s9 }
 0x968   :  { %1659 = vpow2.f32 %v1102_v8 }
 0x972   :  { %v1660_v14 = vpop.eup %1659 }
 0x973   :  { %1105 = vrot.lane.b32.xlu1 %v1660_v14, %s1667_s9 }
 0x977   :  { %556 = vrot.lane.b32.xlu1 %v1326_v15, %s1671_s21 }
 0x97b   :  { %926 = vrot.lane.b32.xlu1 %v914_v47, %s1667_s9 }
 0x985   :  { %743 = vadd.xlane.f32.xlu0 %v742_v17 }
 0x9d8   :  { %v1112_v26 = vpop.permute.xlu0 %1111 }
 0x9d9   :  { %v1114_v28 = vsel %vm559_vm7, %v1112_v26, 0.0 }
 0x9e5   :  { %v1106_v18 = vpop.permute.xlu1 %1105 }
 0x9e6   :  { %v1108_v19 = vmul.f32 %v1106_v18, %v924_v59 }
 0x9e8   :  { %v1109_v22 = vadd.f32 %v1108_v19, %v1099_v6 }
 0x9e9   :  { %v557_v24 = vpop.permute.xlu1 %556 }
 0x9ea   :  { %1505 = vmatmul.mubr.msk.f32.vlgmr.msra.gmra.mrb[6].mxu0 %vm559_vm7, %v1109_v22  ;;  %v560_v25 = vsel %vm559_vm7, %v557_v24, 0.0 }
 0x9eb   :  { %1508 = vmatpush3.msk.msra.mxu0 %vm573_vm6, %v1118_v23  ;;  %561 = vadd.xlane.f32.xlu1 %v560_v25 }
 0x9ec   :  { %1509 = vmatprep.mubr.msk.f32.mxu0 %vm1662_vm0, %v1663_v21  ;;  %v1343_v21 = vld [vmem:[%s2089_s2 + $0x1e0] ss:$0 sm:$0xff] }
 0x9ed   :  { %v927_v27 = vpop.permute.xlu1 %926 }
 0x9ee   :  { %1510 = vmatmul.mubr.msk.f32.vlgmr.msra.gmra.mrb[8].mxu0 %vm1198_vm8, %v1909_v35  ;;  %v929_v29 = vsel %vm559_vm7, %v927_v27, 0.0 }
 0x9ef   :  { %1115 = vadd.xlane.f32.xlu1 %v1114_v28  ;;  %930 = vadd.xlane.f32.xlu0 %v929_v29 }
 0xa12   :  { %v744_v30 = vpop.xlane.xlu0 %743 }
 0xa78   :  { %v562_v31 = vpop.xlane.xlu1 %561 }
 0xa79   :  { %v745_v36 = vsub.f32 %v562_v31, %v744_v30 }
 0xa7c   :  { %v931_v33 = vpop.xlane.xlu0 %930  ;;  %v1116_v40 = vpop.xlane.xlu1 %1115 }
 0xa7d   :  { %v932_v37 = vsub.f32 %v745_v36, %v931_v33 }
 0xa7f   :  { %v1117_v42 = vsub.f32 %v932_v37, %v1116_v40 }
 0xabd   :  { %v1194_v32 = vpop.f32.mrb[6].mxu0 }
 0xabe   :  { %v1506_v34 = vpop.f32.mrb[7].mxu0 }
 0xac1   :  { %v1270_v38 = vpop.f32.mrb[8].mxu0 }
 0xac2   :  { %v1271_v39 = vadd.f32 %v1270_v38, %v1194_v32  ;;  %v1511_v35 = vpop.f32.mrb[9].mxu0 }
 0xac4   :  { %v1279_v41 = vadd.f32 %v1343_v21, %v1271_v39 }
 0xac6   :  { %1280 = vst.msk [vmem:[%s2090_s3] sm:$0xff] %vm559_vm7, %v1279_v41 }
 0xac7   :  { %1282 = vst.msk [vmem:[%s2090_s3] sm:$0xff] %vm1281_vm9, %v1117_v42 }

</bundles_post_ra>
